<compile_context>
chip_gen: v7x
topology: tpu7x:2x2x1
jax: 0.10.0
libtpu: 0.0.40
codegen_flags: <defaults>
</compile_context>

<pallas_src>
import numpy as np
import jax
import jax.numpy as jnp
from jax import lax
from jax.experimental import pallas as pl
from jax.experimental.pallas import tpu as pltpu

# ----------------------------- config (KITTI PointPillars dense-head) --------
NUM_CLASSES = 3            # Car / Pedestrian / Cyclist
NUM_DIR_BINS = 2
DIR_OFFSET = 0.78539       # model_cfg.DIR_OFFSET
DIR_LIMIT_OFFSET = 0.0     # model_cfg.DIR_LIMIT_OFFSET
BOX_DIM = 7                # (x, y, z, dx, dy, dz, heading)
SCORE_THRESH = 0.1
POST_MAX_SIZE = 100
MAX_BLOCK_S = 512          # sublane rows per grid step (multiple of 16 for bf16)

PERIOD_F = np.float32(2.0 * np.pi / NUM_DIR_BINS)
INV_PERIOD_F = np.float32(1.0 / (2.0 * np.pi / NUM_DIR_BINS))
DIR_OFFSET_F = np.float32(DIR_OFFSET)
DIR_LIMIT_OFFSET_F = np.float32(DIR_LIMIT_OFFSET)
# sigmoid(x) >= SCORE_THRESH  <=>  x >= logit(SCORE_THRESH)  (exact, no approx)
LOGIT_THRESH_F = np.float32(np.log(SCORE_THRESH / (1.0 - SCORE_THRESH)))

ANCHOR_SIZES = np.array([[3.9, 1.6, 1.56],
                         [0.8, 0.6, 1.73],
                         [1.76, 0.6, 1.73]], dtype=np.float32)
ANCHOR_ZS = np.array([-1.78, -0.6, -0.6], dtype=np.float32)
ANCHOR_ROTS = np.array([0.0, np.pi / 2], dtype=np.float32)
PC_RANGE_X = 69.12
PC_RANGE_Y = 79.36
Y_MIN = 39.68


# ----------------------------- stage 1: Pallas score kernel ------------------
def _make_score_kernel(block_s, n_total):
    def kernel(cls_ref, scores_ref):
        # cls_ref: (3, block_s, 128) bf16; each per-class slab is a full
        # lane/sublane-dense tile.  Compute in f32 (VALU slack is huge).
        c0 = cls_ref[0].astype(jnp.float32)
        c1 = cls_ref[1].astype(jnp.float32)
        c2 = cls_ref[2].astype(jnp.float32)
        best = jnp.maximum(jnp.maximum(c0, c1), c2)      # class-agnostic max logit

        # sigmoid(max logit) == max(sigmoid): one exp + one EUP approx reciprocal
        score = pl.reciprocal(1.0 + jnp.exp(-best), approx=True)

        # exact threshold in logit domain + index mask for layout padding
        row = lax.broadcasted_iota(jnp.int32, (block_s, 128), 0)
        lane = lax.broadcasted_iota(jnp.int32, (block_s, 128), 1)
        gidx = (pl.program_id(0) * block_s + row) * 128 + lane
        keep = (best >= LOGIT_THRESH_F) & (gidx < n_total)
        # invalid / padded anchors -> -1.0 sentinel (feeds lax.top_k directly)
        scores_ref[...] = jnp.where(keep, score, -1.0)
    return kernel


def pp_score_pallas(cls_packed, n_total, block_s):
    """cls_packed: (3, S, 128) bf16 -> thresholded scores (S, 128) f32."""
    s_pad = cls_packed.shape[1]
    assert s_pad % block_s == 0
    grid = (s_pad // block_s,)
    # TODO(synk): on v7x, pltpu.CORE_PARALLEL on this (even) grid axis shards it
    # across both TensorCores; "parallel" is kept here for v5e/v6e portability.
    return pl.pallas_call(
        _make_score_kernel(block_s, n_total),
        out_shape=jax.ShapeDtypeStruct((s_pad, 128), jnp.float32),
        grid=grid,
        in_specs=[pl.BlockSpec((NUM_CLASSES, block_s, 128), lambda i: (0, i, 0))],
        out_specs=pl.BlockSpec((block_s, 128), lambda i: (i, 0)),
        compiler_params=pltpu.CompilerParams(
            dimension_semantics=("parallel",),
            vmem_limit_bytes=32 * 1024 * 1024,
        ),
    )(cls_packed)


# ----------------------------- layout helpers --------------------------------
def _plan(n):
    """Return (s_pad, block_s): s_pad*128 >= n, block_s a multiple of 16 (bf16
    tiles) and <= MAX_BLOCK_S, with an EVEN number (>= 2) of grid steps so the
    BlockSpec pipeline always has DMA/compute overlap and v7x can use both TCs."""
    s = -(-n // 128)
    if s <= 2 * MAX_BLOCK_S:
        block_s = max(16, ((-(-s // 2) + 15) // 16) * 16)
        return 2 * block_s, block_s
    n_blocks = -(-s // MAX_BLOCK_S)
    n_blocks += n_blocks % 2                      # round step count up to even
    return n_blocks * MAX_BLOCK_S, MAX_BLOCK_S


def _pack_cls(cls_preds, n, n_pad):
    """(..., A*3) cls map -> (3, S, 128) feature-major bf16 layout.
    Only cls is repacked now (3 channels); box/dir/anchors stay in their natural
    layouts and are only gathered for the K top-scoring anchors.
    # TODO(synk): emit the cls head channel-major upstream to remove this too."""
    xt = cls_preds.reshape(n, NUM_CLASSES).astype(jnp.bfloat16).T      # (3, n)
    xt = jnp.pad(xt, ((0, 0), (0, n_pad - n)))
    return xt.reshape(NUM_CLASSES, n_pad // 128, 128)


# ----------------------------- stage 2: K-row decode (plain JAX) -------------
def _anchors_from_index(idx, H, W):
    """Analytic anchors for a handful of flat anchor indices.
    Anchor layout is (H, W, class, rot, 7); anchors never touch HBM."""
    A = NUM_CLASSES * NUM_DIR_BINS
    rot_i = idx % NUM_DIR_BINS
    cls_i = (idx // NUM_DIR_BINS) % NUM_CLASSES
    w_i = (idx // A) % W
    h_i = idx // (A * W)
    sizes = jnp.asarray(ANCHOR_SIZES)
    zs = jnp.asarray(ANCHOR_ZS)
    rots = jnp.asarray(ANCHOR_ROTS)
    xa = (w_i.astype(jnp.float32) + 0.5) * np.float32(PC_RANGE_X / W)
    ya = (h_i.astype(jnp.float32) + 0.5) * np.float32(PC_RANGE_Y / H) - np.float32(Y_MIN)
    za = zs[cls_i]
    sz = sizes[cls_i]                                 # (K, 3)
    ra = rots[rot_i]
    return xa, ya, za, sz[:, 0], sz[:, 1], sz[:, 2], ra


def _decode_rows(box_sel, dir_sel, anchor_cols):
    """ResidualCoder.decode_torch + direction-classifier correction on (K, 7)."""
    xa, ya, za, dxa, dya, dza, ra = anchor_cols
    xt, yt, zt, dxt, dyt, dzt, rt = [box_sel[:, i] for i in range(BOX_DIM)]
    diag = jnp.sqrt(dxa * dxa + dya * dya)
    xg = xt * diag + xa
    yg = yt * diag + ya
    zg = zt * dza + za
    dxg = jnp.exp(dxt) * dxa
    dyg = jnp.exp(dyt) * dya
    dzg = jnp.exp(dzt) * dza
    rg = rt + ra
    dir_label = (dir_sel[:, 1] > dir_sel[:, 0]).astype(jnp.float32)
    val = rg - DIR_OFFSET_F
    dir_rot = val - jnp.floor(val * INV_PERIOD_F + DIR_LIMIT_OFFSET_F) * PERIOD_F
    rg = dir_rot + DIR_OFFSET_F + PERIOD_F * dir_label
    return jnp.stack([xg, yg, zg, dxg, dyg, dzg, rg], axis=-1)


# ----------------------------- glue (whole post-processing) ------------------
@jax.jit
def pp_post_bev_w_head(cls_preds, box_preds, dir_cls_preds):
    """NHWC dense-head maps (batch_size = 1) -> top-K thresholded detections."""
    _, H, W, _ = box_preds.shape
    n = cls_preds.size // NUM_CLASSES
    s_pad, block_s = _plan(n)
    n_pad = s_pad * 128

    # ---- stage 1: Pallas score kernel over all anchors (cls only) ----
    cls_p = _pack_cls(cls_preds, n, n_pad)
    scores_flat = pp_score_pallas(cls_p, n, block_s).reshape(n_pad)

    # ---- stage 2: top-K select + decode only the K survivors ----
    k = min(POST_MAX_SIZE, n_pad)
    topk_scores, topk_idx = lax.top_k(scores_flat, k)
    idx = jnp.minimum(topk_idx, n - 1)                      # clamp padded picks
    box_sel = box_preds.reshape(n, BOX_DIM)[idx]            # (K, 7) natural layout
    dir_sel = dir_cls_preds.reshape(n, NUM_DIR_BINS)[idx]   # (K, 2)
    cls_sel = cls_preds.reshape(n, NUM_CLASSES)[idx]        # (K, 3)

    boxes = _decode_rows(box_sel, dir_sel, _anchors_from_index(idx, H, W))
    labels = jnp.argmax(cls_sel, axis=-1).astype(jnp.int32) + 1

    # validity from the exact in-kernel logit-domain threshold (sentinel),
    # not by re-thresholding the approximate score.
    valid = topk_scores >= 0.0
    # TODO(synk): rotated-BEV 3D NMS (iou3d_nms_utils.nms_gpu) has no clean
    # Pallas equivalent; candidates are returned thresholded/top-K, unsuppressed.
    return {
        "pred_boxes": boxes,                                # (K, 7)
        "pred_scores": jnp.where(valid, topk_scores, 0.0),
        "pred_labels": jnp.where(valid, labels, 0),
        "valid_mask": valid,
    }


# ----------------------------- pure-JAX / numpy reference --------------------
def make_anchors(H, W):
    """Deterministic synthetic anchors, OpenPCDet ordering (H, W, class, rot, 7)."""
    xs = (np.arange(W, dtype=np.float32) + 0.5) * (PC_RANGE_X / W)
    ys = (np.arange(H, dtype=np.float32) + 0.5) * (PC_RANGE_Y / H) - Y_MIN
    yy, xx = np.meshgrid(ys, xs, indexing="ij")             # (H, W)
    anchors = np.zeros((H, W, NUM_CLASSES, NUM_DIR_BINS, BOX_DIM), dtype=np.float32)
    anchors[..., 0] = xx[:, :, None, None]
    anchors[..., 1] = yy[:, :, None, None]
    anchors[..., 2] = ANCHOR_ZS[None, None, :, None]
    anchors[..., 3] = ANCHOR_SIZES[None, None, :, 0][..., None]
    anchors[..., 4] = ANCHOR_SIZES[None, None, :, 1][..., None]
    anchors[..., 5] = ANCHOR_SIZES[None, None, :, 2][..., None]
    anchors[..., 6] = ANCHOR_ROTS[None, None, None, :]
    return anchors.reshape(-1, BOX_DIM)                     # (N, 7)


def _reference_decode(anchors, box_flat, cls_flat, dir_flat):
    xa, ya, za, dxa, dya, dza, ra = [anchors[:, i] for i in range(7)]
    xt, yt, zt, dxt, dyt, dzt, rt = [box_flat[:, i] for i in range(7)]
    diag = jnp.sqrt(dxa * dxa + dya * dya)
    xg = xt * diag + xa
    yg = yt * diag + ya
    zg = zt * dza + za
    dxg = jnp.exp(dxt) * dxa
    dyg = jnp.exp(dyt) * dya
    dzg = jnp.exp(dzt) * dza
    rg = rt + ra
    dir_labels = jnp.argmax(dir_flat, axis=-1).astype(jnp.float32)
    val = rg - DIR_OFFSET_F
    dir_rot = val - jnp.floor(val * INV_PERIOD_F + DIR_LIMIT_OFFSET_F) * PERIOD_F
    rg = dir_rot + DIR_OFFSET_F + PERIOD_F * dir_labels
    boxes = jnp.stack([xg, yg, zg, dxg, dyg, dzg, rg], axis=-1)
    probs = jax.nn.sigmoid(cls_flat)
    scores = jnp.max(probs, axis=-1)
    labels = jnp.argmax(probs, axis=-1).astype(jnp.int32) + 1
    masked_scores = jnp.where(scores >= SCORE_THRESH, scores, -1.0)
    return boxes, masked_scores, labels


# ----------------------------- main -------------------------------------------
if __name__ == "__main__":
    H, W = 16, 16
    A = NUM_CLASSES * NUM_DIR_BINS                           # 6 anchors / location
    N = H * W * A                                            # 1536 anchors

    key = jax.random.PRNGKey(0)
    k1, k2, k3 = jax.random.split(key, 3)
    cls_preds = jax.random.normal(k1, (1, H, W, A * NUM_CLASSES), jnp.float32)
    box_preds = 0.1 * jax.random.normal(k2, (1, H, W, A * BOX_DIM), jnp.float32)
    dir_cls_preds = jax.random.normal(k3, (1, H, W, A * NUM_DIR_BINS), jnp.float32)

    out = pp_post_bev_w_head(cls_preds, box_preds, dir_cls_preds)
    jax.block_until_ready(out)

    # ---------------- correctness checks ----------------
    s_pad, block_s = _plan(N)
    n_pad = s_pad * 128

    # (a) stage-1 kernel scores vs pure-JAX reference (same bf16 input precision)
    cls_p = _pack_cls(cls_preds, N, n_pad)
    scores_o = pp_score_pallas(cls_p, N, block_s)
    scores_k = np.asarray(scores_o.reshape(n_pad)[:N])

    anchors_full = jnp.asarray(make_anchors(H, W))
    box_flat = box_preds.reshape(N, BOX_DIM)
    dir_flat = dir_cls_preds.reshape(N, NUM_DIR_BINS)
    cls_bf16 = cls_preds.reshape(N, NUM_CLASSES).astype(jnp.bfloat16).astype(jnp.float32)
    _, ref_scores, _ = _reference_decode(anchors_full, box_flat, cls_bf16, dir_flat)
    # scores use the EUP approximate reciprocal -> loose tolerance; sentinel exact
    np.testing.assert_allclose(scores_k, np.asarray(ref_scores), rtol=1e-2, atol=1e-2)

    # (b) end-to-end: top-K decode / labels vs full-precision reference at the
    #     kernel-selected indices
    ref_boxes, _, ref_labels = _reference_decode(
        anchors_full, box_flat, cls_preds.reshape(N, NUM_CLASSES), dir_flat)
    k = min(POST_MAX_SIZE, n_pad)
    topk_scores_t, topk_idx_t = lax.top_k(scores_o.reshape(n_pad), k)
    sel = np.minimum(np.asarray(topk_idx_t), N - 1)
    valid_t = np.asarray(topk_scores_t) >= 0.0
    np.testing.assert_allclose(np.asarray(out["pred_boxes"]),
                               np.asarray(ref_boxes)[sel], rtol=1e-4, atol=1e-4)
    np.testing.assert_array_equal(np.asarray(out["pred_labels"]),
                                  np.where(valid_t, np.asarray(ref_labels)[sel], 0))
    np.testing.assert_allclose(np.asarray(out["pred_scores"]),
                               np.where(valid_t, np.asarray(topk_scores_t), 0.0),
                               rtol=0, atol=1e-6)
    np.testing.assert_array_equal(np.asarray(out["valid_mask"]), valid_t)

    print("KERNEL_OK")
</pallas_src>

<mosaic_0001>
module attributes {stable_mosaic.version = 11 : i64} {
  func.func @kernel(%arg0: i32, %arg1: memref<3x16x128xbf16, #tpu.memory_space<vmem>>, %arg2: memref<16x128xf32, #tpu.memory_space<vmem>>) attributes {dimension_semantics = [#tpu.dimension_semantics<parallel>], iteration_bounds = array<i64: 2>, scalar_prefetch = 0 : i64, scratch_operands = 0 : i64, tpu.core_type = #tpu.core_type<tc>, window_params = [{transform_indices = @transform_0, window_bounds = array<i64: 3, 16, 128>}, {transform_indices = @transform_1, window_bounds = array<i64: 16, 128>}]} {
    %c0 = arith.constant 0 : index
    %c0_0 = arith.constant 0 : index
    %c0_1 = arith.constant 0 : index
    %0 = vector.load %arg1[%c0, %c0_0, %c0_1] : memref<3x16x128xbf16, #tpu.memory_space<vmem>>, vector<1x16x128xbf16>
    %1 = vector.shape_cast %0 : vector<1x16x128xbf16> to vector<16x128xbf16>
    %2 = arith.extf %1 : vector<16x128xbf16> to vector<16x128xf32>
    %c1 = arith.constant 1 : index
    %c0_2 = arith.constant 0 : index
    %c0_3 = arith.constant 0 : index
    %3 = vector.load %arg1[%c1, %c0_2, %c0_3] : memref<3x16x128xbf16, #tpu.memory_space<vmem>>, vector<1x16x128xbf16>
    %4 = vector.shape_cast %3 : vector<1x16x128xbf16> to vector<16x128xbf16>
    %5 = arith.extf %4 : vector<16x128xbf16> to vector<16x128xf32>
    %c2 = arith.constant 2 : index
    %c0_4 = arith.constant 0 : index
    %c0_5 = arith.constant 0 : index
    %6 = vector.load %arg1[%c2, %c0_4, %c0_5] : memref<3x16x128xbf16, #tpu.memory_space<vmem>>, vector<1x16x128xbf16>
    %7 = vector.shape_cast %6 : vector<1x16x128xbf16> to vector<16x128xbf16>
    %8 = arith.extf %7 : vector<16x128xbf16> to vector<16x128xf32>
    %9 = arith.maximumf %2, %5 : vector<16x128xf32>
    %10 = arith.maximumf %9, %8 : vector<16x128xf32>
    %cst = arith.constant 0.000000e+00 : f32
    %11 = vector.broadcast %cst : f32 to vector<16x128xf32>
    %12 = arith.subf %11, %10 : vector<16x128xf32>
    %13 = math.exp %12 : vector<16x128xf32>
    %cst_6 = arith.constant 1.000000e+00 : f32
    %14 = vector.broadcast %cst_6 : f32 to vector<16x128xf32>
    %15 = arith.addf %14, %13 : vector<16x128xf32>
    %16 = tpu.reciprocal %15 {approx = true} : vector<16x128xf32> -> vector<16x128xf32>
    %17 = tpu.iota {dimensions = array<i32: 0>} : vector<16x128xi32>
    %18 = tpu.iota {dimensions = array<i32: 1>} : vector<16x128xi32>
    %c16_i32 = arith.constant 16 : i32
    %19 = arith.muli %arg0, %c16_i32 : i32
    %20 = vector.broadcast %19 : i32 to vector<16x128xi32>
    %21 = arith.addi %20, %17 : vector<16x128xi32>
    %c128_i32 = arith.constant 128 : i32
    %22 = vector.broadcast %c128_i32 : i32 to vector<16x128xi32>
    %23 = arith.muli %21, %22 : vector<16x128xi32>
    %24 = arith.addi %23, %18 : vector<16x128xi32>
    %cst_7 = arith.constant -2.19722462 : f32
    %25 = vector.broadcast %cst_7 : f32 to vector<16x128xf32>
    %26 = arith.cmpf oge, %10, %25 : vector<16x128xf32>
    %c1536_i32 = arith.constant 1536 : i32
    %27 = vector.broadcast %c1536_i32 : i32 to vector<16x128xi32>
    %28 = arith.cmpi slt, %24, %27 : vector<16x128xi32>
    %29 = arith.andi %26, %28 : vector<16x128xi1>
    %cst_8 = arith.constant -1.000000e+00 : f32
    %30 = vector.broadcast %cst_8 : f32 to vector<16x128xf32>
    %31 = arith.select %29, %16, %30 : vector<16x128xi1>, vector<16x128xf32>
    %c0_9 = arith.constant 0 : index
    %c0_10 = arith.constant 0 : index
    %32 = vector.load %arg2[%c0_9, %c0_10] : memref<16x128xf32, #tpu.memory_space<vmem>>, vector<16x128xf32>
    tpu.vector_store %arg2[%c0_9, %c0_10], %31 {strides = array<i32>} : memref<16x128xf32, #tpu.memory_space<vmem>>, vector<16x128xf32>,
    return
  }
  func.func @transform_0(%arg0: i32) -> (i32, i32, i32) {
    %c0_i32 = arith.constant 0 : i32
    %c0_i32_0 = arith.constant 0 : i32
    %c0_i32_1 = arith.constant 0 : i32
    return %c0_i32, %arg0, %c0_i32_0 : i32, i32, i32
  }
  func.func @transform_1(%arg0: i32) -> (i32, i32) {
    %c0_i32 = arith.constant 0 : i32
    %c0_i32_0 = arith.constant 0 : i32
    return %arg0, %c0_i32 : i32, i32
  }
}

</mosaic_0001>

<bundles_post_ra>
// kernel: pp_post_bev_w_head.1
= control target key start
LH: loop header
LB: loop body
LE: loop exit
PB: predicated region body
PF: predicated region fallthrough
CT: control target
= control target key end

     0   :  { %s393_s6 = smov 0   ;;  %s395_s7 = smov 0   ;;  %s447_s0 = inlined_call_operand.vmem [shape: bf16[3,32,128], index: 0, kind: input, shape index: {}]   ;;  %s448_s1 = inlined_call_operand.vmem [shape: f32[32,128], index: 1, kind: output, shape index: {}]  }
   0x1   :  { %s397_s8 = smov 0  }
   0x2 LB: > { %s294_s9 = sadd.s32 4294967295, %s381_s8   ;;  %s410_s10 = sadd.s32 1, %s381_s8   ;;  %s381_s8 = sphi %s397_s8, %s451_s8   ;;  %s377_s7 = sphi %s395_s7, %s450_s7   ;;  %s373_s6 = sphi %s393_s6, %s449_s6  }
   0x3   : > { %s15_s11 = ssub.s32 %s381_s8, %s410_s10  ;;  %s18_s12 = sadd.s32 1, %s377_s7 }
   0x4   : > { %p16_p0 = scmp.eq.s32.totalorder %s15_s11, 0  ;;  %p25_p1 = scmp.ne.s32.totalorder %s377_s7, %s373_s6 }
   0x5   : > { %p26_p2 = scmp.eq.s32.totalorder %s381_s8, 0  ;;  %p297_p4 = scmp.ge.s32.totalorder %s381_s8, 2 }
   0x6   : > { %s419_s13 = scalar_select %p16_p0, %s377_s7, %s18_s12  }
   0x7   : > { %p27_p3 = por %p26_p2, %p25_p1  ;;  %77 = sbr.rel (%p297_p4) target bundleno = 21 (0x15), region = 16 }
   0xe   : > { %80 = sbr.rel (!%p27_p3) target bundleno = 21 (0x15), region = 20  ;;  %s82_s14 = sand.u32 (%p27_p3), 1, %s377_s7  }
   0xf   : > { %s310_s15 = sshll.u32 (%p27_p3), %s381_s8, 3  ;;  %s325_s16 = smul.u32 (%p27_p3), 24, %s82_s14 }
  0x10   : > { %s87_s19 = scalar_lea.vmem (%p27_p3), %s447_s0, %s310_s15 }
  0x11   : > { %v103_v0 = vld [vmem:[%s87_s19] sm:$0xff] (%p27_p3)   ;;  %v107_v1 = vld [vmem:[%s87_s19 + $0x10] sm:$0xff] (%p27_p3)   ;;  %s84_s20 = scalar_lea.vmem (%p27_p3), [#allocation2], %s325_s16 }
  0x12   : > { %v111_v2 = vld [vmem:[%s87_s19 + $0x20] sm:$0xff] (%p27_p3)   ;;  %104 = vst [vmem:[%s84_s20] sm:$0xff] (%p27_p3), %v103_v0   ;;  %108 = vst [vmem:[%s84_s20 + $0x8] sm:$0xff] (%p27_p3), %v107_v1  }
  0x13   : > { %112 = vst [vmem:[%s84_s20 + $0x10] sm:$0xff] (%p27_p3), %v111_v2  }
  0x15 PF: > { %p300_p5 = scmp.ge.s32.totalorder %s381_s8, 1  ;;  %p148_p6 = scmp.lt.s32.totalorder %s381_s8, 3 }
  0x17   : > { %p149_p7 = pnand %p300_p5, %p148_p6 }
  0x18   : > { %s155_s21 = sand.u32 (!%p149_p7), 1, %s373_s6   ;;  %v209_v15 = vlaneseq (!%p149_p7)  ;;  %s307_s24 = sshll.u32 (!%p149_p7), %s294_s9, 4 }
  0x19   : > { %152 = sbr.rel (%p149_p7) target bundleno = 67 (0x43), region = 61  ;;  %v215_v22 = vstv (!%p149_p7), %s307_s24  ;;  %s301_s25 = sshll.u32 (!%p149_p7), %s294_s9, 1 }
  0x1a   : > { %s326_s22 = smul.u32 (!%p149_p7), 24, %s155_s21  ;;  %v210_v20 = vshrl.u32 (!%p149_p7), %v209_v15, 7  ;;  %v213_v27 = vand.u32 (!%p149_p7), 127, %v209_v15  ;;  %p176_p8 = scmp.lt.s32.totalorder (!%p149_p7), %s301_s25, 3 }
  0x1c   : > { %s157_s23 = scalar_lea.vmem (!%p149_p7), [#allocation2], %s326_s22  ;;  %v211_v23 = vadd.s32 (!%p149_p7), 8, %v210_v20  ;;  %v216_v24 = vadd.s32 (!%p149_p7), %v215_v22, %v210_v20 }
  0x1d   : > { %v312_v3 = vld [vmem:[%s157_s23] sm:$0xff] (!%p149_p7)   ;;  %v323_v4 = vld [vmem:[%s157_s23 + $0x8] sm:$0xff] (!%p149_p7)   ;;  %v324_v5 = vld [vmem:[%s157_s23 + $0x10] sm:$0xff] (!%p149_p7)  }
  0x1e   : > { %v313_v6 = vunpack.c.l.bf16 (!%p149_p7), %v312_v3  ;;  %v317_v7 = vunpack.c.l.bf16 (!%p149_p7), %v323_v4  ;;  %v321_v8 = vunpack.c.l.bf16 (!%p149_p7), %v324_v5  ;;  %v314_v9 = vunpack.c.h.bf16 (!%p149_p7), %v312_v3 }
  0x1f   : > { %v318_v10 = vunpack.c.h.bf16 (!%p149_p7), %v323_v4  ;;  %v322_v11 = vunpack.c.h.bf16 (!%p149_p7), %v324_v5  ;;  %v217_v25 = vadd.s32 (!%p149_p7), %v215_v22, %v211_v23  ;;  %v218_v28 = vmul.u32 (!%p149_p7), 128, %v216_v24 }
  0x20   : > { %v195_v12 = vmax.f32 %v313_v6, %v317_v7  ;;  %s453_s25 = smov (!%p176_p8, %s301_s25), 3 }
  0x21   : > { %v196_v13 = vmax.f32 %v314_v9, %v318_v10  ;;  %v219_v31 = vmul.u32 128, %v217_v25  ;;  %v220_v33 = vadd.s32 %v218_v28, %v213_v27  ;;  %s302_s26 = sshll.u32 %s453_s25, 3 }
  0x22   : > { %v197_v14 = vmax.f32 %v195_v12, %v321_v8  ;;  %s179_s29 = scalar_lea.vmem %s448_s1, %s302_s26 }
  0x23   : > { %v198_v16 = vmax.f32 %v196_v13, %v322_v11  ;;  %v221_v34 = vadd.s32 %v219_v31, %v213_v27  ;;  %vm224_vm1 = vcmp.lt.s32.totalorder %v220_v33, 1536 }
  0x24   : > { %v199_v17 = vsub.f32 0.0, %v197_v14  ;;  %vm222_vm0 = vcmp.ge.f32.partialorder %v197_v14, -2.1972246 }
  0x25   : > { %v200_v18 = vsub.f32 0.0, %v198_v16  ;;  %vm223_vm2 = vcmp.ge.f32.partialorder %v198_v16, -2.1972246  ;;  %vm225_vm3 = vcmp.lt.s32.totalorder %v221_v34, 1536  ;;  %vm226_vm4 = vmand %vm222_vm0, %vm224_vm1 }
  0x26   : > { %v201_v19 = vmul.f32 1.442695, %v199_v17  ;;  %vm227_vm5 = vmand %vm223_vm2, %vm225_vm3 }
  0x27   : > { %v203_v21 = vmul.f32 1.442695, %v200_v18 }
  0x28   : > { %351 = vpow2.f32 %v201_v19 }
  0x29   : > { %353 = vpow2.f32 %v203_v21 }
  0x32   : > { %v352_v26 = vpop.eup %351 }
  0x33   : > { %v354_v29 = vpop.eup %353  ;;  %v205_v30 = vadd.f32 1.0, %v352_v26 }
  0x34   : > { %v206_v32 = vadd.f32 1.0, %v354_v29 }
  0x35   : > { %355 = vrcp.f32 %v205_v30 }
  0x36   : > { %357 = vrcp.f32 %v206_v32 }
  0x3f   : > { %v356_v35 = vpop.eup %355 }
  0x40   : > { %v358_v36 = vpop.eup %357  ;;  %v228_v37 = vsel %vm226_vm4, %v356_v35, -1.0 }
  0x41   : > { %230 = vst [vmem:[%s179_s29] sm:$0xff] %v228_v37  ;;  %v229_v38 = vsel %vm227_vm5, %v358_v36, -1.0 }
  0x42   : > { %231 = vst [vmem:[%s179_s29 + $0x8] sm:$0xff] %v229_v38 }
  0x43 PF: > { %p8_p9 = scmp.ge.s32.totalorder %s410_s10, 4   ;;  %s449_s6 = smov %s377_s7 }
  0x44   : > { %s450_s7 = smov %s419_s13  ;;  %s451_s8 = smov %s410_s10 }
  0x45   :  { %10 = sbr.rel (!%p8_p9) target bundleno = 2 (0x2), region = 102 }

</bundles_post_ra>
